<compile_context>
chip_gen: v5e
topology: v5e:2x2
jax: 0.10.0
libtpu: 0.0.40
codegen_flags: <defaults>
</compile_context>

<pallas_src>
import functools

import jax
import jax.numpy as jnp
from jax.experimental import pallas as pl
from jax.experimental.pallas import tpu as pltpu


def _round_up(x, m):
    return (x + m - 1) // m * m


def _default_tanh_dtype():
    # bf16 tanh rides the v6e/v7x bf16 EUP path (~2x f32); v2-v5 have no bf16
    # VPU/EUP, so keep tanh in f32 there.
    try:
        kind = jax.devices()[0].device_kind.lower()
    except Exception:
        return jnp.float32
    if any(v in kind for v in ("v2", "v3", "v4", "v5")):
        return jnp.float32
    return jnp.bfloat16


def _choose_tiles(batch, tb_max=512):
    """Pick (batch tile, padded batch).  Multi-tile tb is a multiple of 128."""
    b_min = _round_up(batch, 8)
    if b_min <= 128:
        return b_min, b_min                  # tiny batch: single tile
    # >= 2 grid steps so v7x's second TensorCore is never idle; tile capped by VMEM.
    tb = min(tb_max, _round_up(pl.cdiv(b_min, 2), 128))
    return tb, _round_up(b_min, tb)


def _ffpolicy_kernel(x_ref, w1_ref, b1_ref, w2_ref, b2_ref, wv_ref, bv_ref,
                     value_ref, actor_ref, *, h_pad, tanh_dtype):
    # In-kernel bf16 cast of the activation tile (free VPU slot; avoids an extra
    # wrapper HBM pass when the inputs arrive f32).
    xb = x_ref[...].astype(jnp.bfloat16)

    # Layer 1: actor|critic fused along N -> one MXU pass, one tanh over (tb, 2H).
    z1 = jnp.dot(xb, w1_ref[...], preferred_element_type=jnp.float32) + b1_ref[...]
    h1 = jnp.tanh(z1.astype(tanh_dtype)).astype(jnp.bfloat16)

    # Layer 2: stacked (2, H, H) weight, two dots.  No zero off-diagonal blocks:
    # half the resident weight bytes and no wasted MXU tiles on v5e.
    za = (jnp.dot(h1[:, :h_pad], w2_ref[0], preferred_element_type=jnp.float32)
          + b2_ref[:, :h_pad])
    zc = (jnp.dot(h1[:, h_pad:], w2_ref[1], preferred_element_type=jnp.float32)
          + b2_ref[:, h_pad:])
    ha = jnp.tanh(za.astype(tanh_dtype))
    hc = jnp.tanh(zc.astype(tanh_dtype))

    # Value head: VPU multiply + lane reduction (no 1-wide matmul), stored as a
    # true (tb, 1) column — no replicated 128-lane slab.
    v = jnp.sum(hc.astype(jnp.float32) * wv_ref[...], axis=-1, keepdims=True)
    value_ref[...] = (v + bv_ref[...]).astype(value_ref.dtype)

    # Actor features written back in bf16 (halves the largest HBM output stream).
    actor_ref[...] = ha.astype(actor_ref.dtype)


def fuse_params(params, matmul_dtype=jnp.bfloat16):
    """Fuse actor/critic trunks into padded kernel operands.

    w1 : (OBS_pad, 2*H_pad)   cols [0:H]=actor L1, [H_pad:H_pad+H]=critic L1
    w2 : (2, H_pad, H_pad)    stacked (actor L2, critic L2) — no zero blocks
    wv : (1, H_pad)           value-head row (VPU reduction in-kernel)
    bv : (1, 1)               value bias scalar
    Matmul weights stored bf16; biases / value head stay f32.
    """
    obs, h = params["w1a"].shape
    obs_pad = _round_up(obs, 128)
    h_pad = _round_up(h, 128)

    w1 = jnp.zeros((obs_pad, 2 * h_pad), jnp.float32)
    w1 = w1.at[:obs, :h].set(params["w1a"])
    w1 = w1.at[:obs, h_pad:h_pad + h].set(params["w1c"])

    b1 = jnp.zeros((1, 2 * h_pad), jnp.float32)
    b1 = b1.at[:, :h].set(params["b1a"])
    b1 = b1.at[:, h_pad:h_pad + h].set(params["b1c"])

    w2 = jnp.zeros((2, h_pad, h_pad), jnp.float32)
    w2 = w2.at[0, :h, :h].set(params["w2a"])
    w2 = w2.at[1, :h, :h].set(params["w2c"])

    b2 = jnp.zeros((1, 2 * h_pad), jnp.float32)
    b2 = b2.at[:, :h].set(params["b2a"])
    b2 = b2.at[:, h_pad:h_pad + h].set(params["b2c"])

    wv = jnp.zeros((1, h_pad), jnp.float32).at[:, :h].set(params["wv"][:, 0][None, :])
    bv = params["bv"].astype(jnp.float32).reshape(1, 1)

    return {"w1": w1.astype(matmul_dtype), "b1": b1,
            "w2": w2.astype(matmul_dtype), "b2": b2,
            "wv": wv, "bv": bv}


def ffpolicy_forward(inputs, states, masks, fused, *, hidden, tb_max=512,
                     tanh_dtype=None):
    """Returns (value, x, states) like FFPolicy.forward of a concrete MLP policy."""
    del masks  # feed-forward policy: masks only affect recurrent states
    if tanh_dtype is None:
        tanh_dtype = _default_tanh_dtype()

    B, obs = inputs.shape
    obs_pad = fused["w1"].shape[0]
    h_pad = fused["w1"].shape[1] // 2
    tb, b_pad = _choose_tiles(B, tb_max)

    if (B, obs) == (b_pad, obs_pad):
        x_p = inputs                       # f32 straight through; kernel casts on the VPU
    else:
        # padding is needed anyway -> fuse pad + bf16 cast into one wrapper write
        x_p = jnp.zeros((b_pad, obs_pad), jnp.bfloat16).at[:B, :obs].set(
            inputs.astype(jnp.bfloat16))

    in_bytes = int(x_p.size) * x_p.dtype.itemsize + sum(
        int(v.size) * v.dtype.itemsize for v in fused.values())
    out_bytes = b_pad * h_pad * 2 + b_pad * 4
    cost = pl.CostEstimate(
        flops=int(b_pad * (4 * obs_pad * h_pad + 4 * h_pad * h_pad + 2 * h_pad)),
        transcendentals=int(b_pad * 4 * h_pad),
        bytes_accessed=int(in_bytes + out_bytes))

    x_item = jnp.dtype(x_p.dtype).itemsize
    vmem_est = (2 * tb * obs_pad * x_item                        # x tile (double-buffered)
                + (obs_pad * 2 * h_pad + 2 * h_pad * h_pad) * 2  # bf16 weights (single-buffered)
                + (5 * h_pad + 1) * 4                            # biases + value head
                + 2 * tb * h_pad * 2                             # actor out bf16 (double-buffered)
                + 2 * tb * 128 * 4                               # value out (lane-padded in VMEM)
                + 3 * tb * 2 * h_pad * 4)                        # f32 intermediates headroom
    vmem_limit = int(min(max(2 * vmem_est, 16 * 1024 * 1024), 48 * 1024 * 1024))

    def _resident(shape):
        zeros = (0,) * len(shape)
        # grid-invariant operand: single-buffered (halves weight VMEM footprint)
        return pl.BlockSpec(shape, lambda i, _z=zeros: _z,
                            pipeline_mode=pl.Buffered(1))

    grid_spec = pltpu.PrefetchScalarGridSpec(
        num_scalar_prefetch=0,
        grid=(b_pad // tb,),
        in_specs=[
            pl.BlockSpec((tb, obs_pad), lambda i: (i, 0)),   # x: tiled over batch
            _resident((obs_pad, 2 * h_pad)),                 # w1 (fused actor|critic)
            _resident((1, 2 * h_pad)),                       # b1
            _resident((2, h_pad, h_pad)),                    # w2 (stacked actor/critic)
            _resident((1, 2 * h_pad)),                       # b2
            _resident((1, h_pad)),                           # wv
            _resident((1, 1)),                               # bv
        ],
        out_specs=(
            pl.BlockSpec((tb, 1), lambda i: (i, 0)),         # value column (no slab)
            pl.BlockSpec((tb, h_pad), lambda i: (i, 0)),     # actor features, lane-dense bf16
        ),
    )

    value_p, actor_p = pl.pallas_call(
        functools.partial(_ffpolicy_kernel, h_pad=h_pad, tanh_dtype=tanh_dtype),
        out_shape=(
            jax.ShapeDtypeStruct((b_pad, 1), jnp.float32),
            jax.ShapeDtypeStruct((b_pad, h_pad), jnp.bfloat16),
        ),
        grid_spec=grid_spec,
        compiler_params=pltpu.CompilerParams(
            dimension_semantics=("parallel",),   # batch axis shards across v7x's 2 TCs
            vmem_limit_bytes=vmem_limit),
        cost_estimate=cost,
    )(x_p, fused["w1"], fused["b1"], fused["w2"], fused["b2"],
      fused["wv"], fused["bv"])

    value = value_p[:B]                       # (B, 1) f32
    actor_x = actor_p[:B, :hidden]            # (B, hidden) bf16; dist head upcasts
    return value, actor_x, states


def init_params(key, obs_dim, hidden):
    ks = jax.random.split(key, 10)

    def w(k, shape, scale=0.1):
        return (scale * jax.random.normal(k, shape)).astype(jnp.float32)

    return {
        "w1a": w(ks[0], (obs_dim, hidden)),
        "b1a": jnp.zeros((1, hidden), jnp.float32),
        "w2a": w(ks[1], (hidden, hidden)),
        "b2a": jnp.zeros((1, hidden), jnp.float32),
        "w1c": w(ks[2], (obs_dim, hidden)),
        "b1c": jnp.zeros((1, hidden), jnp.float32),
        "w2c": w(ks[3], (hidden, hidden)),
        "b2c": jnp.zeros((1, hidden), jnp.float32),
        "wv":  w(ks[4], (hidden, 1)),
        "bv":  jnp.zeros((1, 1), jnp.float32),
    }


if __name__ == "__main__":
    B, OBS, H = 2, 16, 32
    key = jax.random.PRNGKey(0)
    k_in, k_p = jax.random.split(key)

    inputs = jax.random.normal(k_in, (B, OBS), dtype=jnp.float32)
    states = jnp.zeros((B, 1), dtype=jnp.float32)   # passed through (FF policy)
    masks = jnp.ones((B, 1), dtype=jnp.float32)     # unused by FF policy
    params = init_params(k_p, OBS, H)
    fused = fuse_params(params)                     # fuse + pad + bf16 once

    fwd = jax.jit(functools.partial(
        ffpolicy_forward, hidden=H, tanh_dtype=_default_tanh_dtype()))
    value, x, states_out = fwd(inputs, states, masks, fused)
    jax.block_until_ready((value, x, states_out))

    # sanity check against pure-JAX f32 reference (bf16 matmuls -> loose atol)
    ha = jnp.tanh(inputs @ params["w1a"] + params["b1a"])
    ha = jnp.tanh(ha @ params["w2a"] + params["b2a"])
    hc = jnp.tanh(inputs @ params["w1c"] + params["b1c"])
    hc = jnp.tanh(hc @ params["w2c"] + params["b2c"])
    v_ref = hc @ params["wv"] + params["bv"]
    assert value.shape == (B, 1) and x.shape == (B, H)
    assert states_out.shape == states.shape
    assert jnp.allclose(value, v_ref, atol=5e-2), "value mismatch"
    assert jnp.allclose(x.astype(jnp.float32), ha, atol=5e-2), "actor features mismatch"

    print("KERNEL_OK")
</pallas_src>

<mosaic_0001>
module attributes {stable_mosaic.version = 11 : i64} {
  func.func @_ffpolicy_kernel(%arg0: i32, %arg1: memref<8x128xbf16, #tpu.memory_space<vmem>>, %arg2: memref<128x256xbf16, #tpu.memory_space<vmem>>, %arg3: memref<1x256xf32, #tpu.memory_space<vmem>>, %arg4: memref<2x128x128xbf16, #tpu.memory_space<vmem>>, %arg5: memref<1x256xf32, #tpu.memory_space<vmem>>, %arg6: memref<1x128xf32, #tpu.memory_space<vmem>>, %arg7: memref<1x1xf32, #tpu.memory_space<vmem>>, %arg8: memref<8x1xf32, #tpu.memory_space<vmem>>, %arg9: memref<8x128xbf16, #tpu.memory_space<vmem>>) attributes {dimension_semantics = [#tpu.dimension_semantics<parallel>], iteration_bounds = array<i64: 1>, scalar_prefetch = 0 : i64, scratch_operands = 0 : i64, tpu.core_type = #tpu.core_type<tc>, window_params = [{transform_indices = @transform_0, window_bounds = array<i64: 8, 128>}, {pipeline_mode = #tpu.pipeline_mode<synchronous>, transform_indices = @transform_1, window_bounds = array<i64: 128, 256>}, {pipeline_mode = #tpu.pipeline_mode<synchronous>, transform_indices = @transform_2, window_bounds = array<i64: 1, 256>}, {pipeline_mode = #tpu.pipeline_mode<synchronous>, transform_indices = @transform_3, window_bounds = array<i64: 2, 128, 128>}, {pipeline_mode = #tpu.pipeline_mode<synchronous>, transform_indices = @transform_4, window_bounds = array<i64: 1, 256>}, {pipeline_mode = #tpu.pipeline_mode<synchronous>, transform_indices = @transform_5, window_bounds = array<i64: 1, 128>}, {pipeline_mode = #tpu.pipeline_mode<synchronous>, transform_indices = @transform_6, window_bounds = array<i64: 1, 1>}, {transform_indices = @transform_7, window_bounds = array<i64: 8, 1>}, {transform_indices = @transform_8, window_bounds = array<i64: 8, 128>}]} {
    %c0 = arith.constant 0 : index
    %c0_0 = arith.constant 0 : index
    %0 = vector.load %arg1[%c0, %c0_0] : memref<8x128xbf16, #tpu.memory_space<vmem>>, vector<8x128xbf16>
    %c0_1 = arith.constant 0 : index
    %c0_2 = arith.constant 0 : index
    %1 = vector.load %arg2[%c0_1, %c0_2] : memref<128x256xbf16, #tpu.memory_space<vmem>>, vector<128x256xbf16>
    %cst = arith.constant dense<0.000000e+00> : vector<8x256xf32>
    %2 = tpu.matmul %0, %1, %cst {dimension_numbers = #tpu.dot_dimension_numbers<[1], [0], [0], [1], [0, 0, 1, 1], [], []>} : vector<8x128xbf16>, vector<128x256xbf16>, vector<8x256xf32> -> vector<8x256xf32>
    %c0_3 = arith.constant 0 : index
    %c0_4 = arith.constant 0 : index
    %3 = vector.load %arg3[%c0_3, %c0_4] : memref<1x256xf32, #tpu.memory_space<vmem>>, vector<1x256xf32>
    %4 = vector.broadcast %3 : vector<1x256xf32> to vector<8x256xf32>
    %5 = arith.addf %2, %4 : vector<8x256xf32>
    %6 = arith.truncf %5 : vector<8x256xf32> to vector<8x256xbf16>
    %7 = math.tanh %6 : vector<8x256xbf16>
    %8 = vector.extract_strided_slice %7 {offsets = [0, 0], sizes = [8, 128], strides = [1, 1]} : vector<8x256xbf16> to vector<8x128xbf16>
    %c0_5 = arith.constant 0 : index
    %c0_6 = arith.constant 0 : index
    %c0_7 = arith.constant 0 : index
    %9 = vector.load %arg4[%c0_5, %c0_6, %c0_7] : memref<2x128x128xbf16, #tpu.memory_space<vmem>>, vector<1x128x128xbf16>
    %10 = vector.shape_cast %9 : vector<1x128x128xbf16> to vector<128x128xbf16>
    %cst_8 = arith.constant dense<0.000000e+00> : vector<8x128xf32>
    %11 = tpu.matmul %8, %10, %cst_8 {dimension_numbers = #tpu.dot_dimension_numbers<[1], [0], [0], [1], [0, 0, 1, 1], [], []>} : vector<8x128xbf16>, vector<128x128xbf16>, vector<8x128xf32> -> vector<8x128xf32>
    %c0_9 = arith.constant 0 : index
    %c0_10 = arith.constant 0 : index
    %12 = vector.load %arg5[%c0_9, %c0_10] : memref<1x256xf32, #tpu.memory_space<vmem>>, vector<1x128xf32>
    %13 = vector.broadcast %12 : vector<1x128xf32> to vector<8x128xf32>
    %14 = arith.addf %11, %13 : vector<8x128xf32>
    %15 = vector.extract_strided_slice %7 {offsets = [0, 128], sizes = [8, 128], strides = [1, 1]} : vector<8x256xbf16> to vector<8x128xbf16>
    %c1 = arith.constant 1 : index
    %c0_11 = arith.constant 0 : index
    %c0_12 = arith.constant 0 : index
    %16 = vector.load %arg4[%c1, %c0_11, %c0_12] : memref<2x128x128xbf16, #tpu.memory_space<vmem>>, vector<1x128x128xbf16>
    %17 = vector.shape_cast %16 : vector<1x128x128xbf16> to vector<128x128xbf16>
    %cst_13 = arith.constant dense<0.000000e+00> : vector<8x128xf32>
    %18 = tpu.matmul %15, %17, %cst_13 {dimension_numbers = #tpu.dot_dimension_numbers<[1], [0], [0], [1], [0, 0, 1, 1], [], []>} : vector<8x128xbf16>, vector<128x128xbf16>, vector<8x128xf32> -> vector<8x128xf32>
    %c0_14 = arith.constant 0 : index
    %c128 = arith.constant 128 : index
    %19 = vector.load %arg5[%c0_14, %c128] : memref<1x256xf32, #tpu.memory_space<vmem>>, vector<1x128xf32>
    %20 = vector.broadcast %19 : vector<1x128xf32> to vector<8x128xf32>
    %21 = arith.addf %18, %20 : vector<8x128xf32>
    %22 = arith.truncf %14 : vector<8x128xf32> to vector<8x128xbf16>
    %23 = math.tanh %22 : vector<8x128xbf16>
    %24 = arith.truncf %21 : vector<8x128xf32> to vector<8x128xbf16>
    %25 = math.tanh %24 : vector<8x128xbf16>
    %26 = arith.extf %25 : vector<8x128xbf16> to vector<8x128xf32>
    %c0_15 = arith.constant 0 : index
    %c0_16 = arith.constant 0 : index
    %27 = vector.load %arg6[%c0_15, %c0_16] : memref<1x128xf32, #tpu.memory_space<vmem>>, vector<1x128xf32>
    %28 = vector.broadcast %27 : vector<1x128xf32> to vector<8x128xf32>
    %29 = arith.mulf %26, %28 : vector<8x128xf32>
    %cst_17 = arith.constant dense<0.000000e+00> : vector<8xf32>
    %30 = vector.multi_reduction <add>, %29, %cst_17 [1] : vector<8x128xf32> to vector<8xf32>
    %31 = vector.shape_cast %30 : vector<8xf32> to vector<8x1xf32>
    %c0_18 = arith.constant 0 : index
    %c0_19 = arith.constant 0 : index
    %32 = vector.load %arg7[%c0_18, %c0_19] : memref<1x1xf32, #tpu.memory_space<vmem>>, vector<1x1xf32>
    %33 = vector.broadcast %32 : vector<1x1xf32> to vector<8x1xf32>
    %34 = arith.addf %31, %33 : vector<8x1xf32>
    %c0_20 = arith.constant 0 : index
    %c0_21 = arith.constant 0 : index
    %35 = vector.load %arg8[%c0_20, %c0_21] : memref<8x1xf32, #tpu.memory_space<vmem>>, vector<8x1xf32>
    tpu.vector_store %arg8[%c0_20, %c0_21], %34 {strides = array<i32>} : memref<8x1xf32, #tpu.memory_space<vmem>>, vector<8x1xf32>,
    %c0_22 = arith.constant 0 : index
    %c0_23 = arith.constant 0 : index
    %36 = vector.load %arg9[%c0_22, %c0_23] : memref<8x128xbf16, #tpu.memory_space<vmem>>, vector<8x128xbf16>
    tpu.vector_store %arg9[%c0_22, %c0_23], %23 {strides = array<i32>} : memref<8x128xbf16, #tpu.memory_space<vmem>>, vector<8x128xbf16>,
    return
  }
  func.func @transform_0(%arg0: i32) -> (i32, i32) {
    %c0_i32 = arith.constant 0 : i32
    %c0_i32_0 = arith.constant 0 : i32
    return %arg0, %c0_i32 : i32, i32
  }
  func.func @transform_1(%arg0: i32) -> (i32, i32) {
    %c0_i32 = arith.constant 0 : i32
    %c0_i32_0 = arith.constant 0 : i32
    %c0_i32_1 = arith.constant 0 : i32
    return %c0_i32, %c0_i32_0 : i32, i32
  }
  func.func @transform_2(%arg0: i32) -> (i32, i32) {
    %c0_i32 = arith.constant 0 : i32
    %c0_i32_0 = arith.constant 0 : i32
    %c0_i32_1 = arith.constant 0 : i32
    return %c0_i32, %c0_i32_0 : i32, i32
  }
  func.func @transform_3(%arg0: i32) -> (i32, i32, i32) {
    %c0_i32 = arith.constant 0 : i32
    %c0_i32_0 = arith.constant 0 : i32
    %c0_i32_1 = arith.constant 0 : i32
    %c0_i32_2 = arith.constant 0 : i32
    return %c0_i32, %c0_i32_0, %c0_i32_1 : i32, i32, i32
  }
  func.func @transform_4(%arg0: i32) -> (i32, i32) {
    %c0_i32 = arith.constant 0 : i32
    %c0_i32_0 = arith.constant 0 : i32
    %c0_i32_1 = arith.constant 0 : i32
    return %c0_i32, %c0_i32_0 : i32, i32
  }
  func.func @transform_5(%arg0: i32) -> (i32, i32) {
    %c0_i32 = arith.constant 0 : i32
    %c0_i32_0 = arith.constant 0 : i32
    %c0_i32_1 = arith.constant 0 : i32
    return %c0_i32, %c0_i32_0 : i32, i32
  }
  func.func @transform_6(%arg0: i32) -> (i32, i32) {
    %c0_i32 = arith.constant 0 : i32
    %c0_i32_0 = arith.constant 0 : i32
    %c0_i32_1 = arith.constant 0 : i32
    return %c0_i32, %c0_i32_0 : i32, i32
  }
  func.func @transform_7(%arg0: i32) -> (i32, i32) {
    %c0_i32 = arith.constant 0 : i32
    %c0_i32_0 = arith.constant 0 : i32
    return %arg0, %c0_i32 : i32, i32
  }
  func.func @transform_8(%arg0: i32) -> (i32, i32) {
    %c0_i32 = arith.constant 0 : i32
    %c0_i32_0 = arith.constant 0 : i32
    return %arg0, %c0_i32 : i32, i32
  }
}

</mosaic_0001>

<bundles_post_ra>
// kernel: ffpolicy_forward.1
= control target key start
LH: loop header
LB: loop body
LE: loop exit
PB: predicated region body
PF: predicated region fallthrough
CT: control target
= control target key end

     0   :  { %s709_s0 = inlined_call_operand.vmem [shape: bf16[8,128], index: 0, kind: input, shape index: {}]   ;;  %s710_s1 = inlined_call_operand.hbm [shape: bf16[128,256], index: 1, kind: input, shape index: {}]   ;;  %s711_s2 = inlined_call_operand.vmem [shape: f32[1,256], index: 2, kind: input, shape index: {}]   ;;  %s712_s3 = inlined_call_operand.hbm [shape: bf16[2,128,128], index: 3, kind: input, shape index: {}]   ;;  %s713_s4 = inlined_call_operand.vmem [shape: f32[1,256], index: 4, kind: input, shape index: {}]   ;;  %s714_s5 = inlined_call_operand.vmem [shape: f32[1,128], index: 5, kind: input, shape index: {}]   ;;  %s715_s6 = inlined_call_operand.<no memory space> [shape: f32[1,1], index: 6, kind: input, shape index: {}]   ;;  %s716_s7 = inlined_call_operand.vmem [shape: f32[8,1], index: 7, kind: output, shape index: {0}]   ;;  %s717_s8 = inlined_call_operand.vmem [shape: bf16[8,128], index: 8, kind: output, shape index: {1}]  }
   0x1   :  { %v14_v0 = vstv %s715_s6 }
   0x2   :  { %15 = vst [vmem:[#allocation2] sm:$0x1] %v14_v0 }
   0x3   :  { %16 = vsyncpa [#allocation4], 0  ;;  %s24_s9 = sshll.u32 %s710_s1, 4  ;;  %s25_s9 = int_to_ptr.hbm [resolvable:$true] %s24_s9 }
   0x4   :  { %17 = vsyncpa [#allocation6], 0  ;;  %s628_s10 = smov [#allocation3]   ;;  %s39_s14 = sshll.u32 %s712_s3, 4  ;;  %s40_s14 = int_to_ptr.hbm [resolvable:$true] %s39_s14 }
   0x5   :  { %s26_s11 = sshll.u32 %s628_s10, 4  ;;  %s629_s15 = smov 128   ;;  %s27_s11 = int_to_ptr.vmem [resolvable:$true] %s26_s11 }
   0x6   :  { %s630_s16 = smov 8   ;;  %s631_s6 = smov [#allocation5]  }
   0x7   :  { %32 = dma.hbm_to_vmem [thread:$0]  %s25_s9, 2048, %s27_s11, [#allocation4], %s629_s15, %s629_s15, %s630_s16  }
   0x8   :  { %s41_s17 = sshll.u32 %s631_s6, 4  ;;  %s632_s18 = smov 64   ;;  %s42_s17 = int_to_ptr.vmem [resolvable:$true] %s41_s17 }
   0x9   :  { %s633_s19 = smov 4  }
   0xa   :  { %47 = dma.hbm_to_vmem [thread:$0]  %s40_s14, 2048, %s42_s17, [#allocation6], %s632_s18, %s632_s18, %s633_s19  }
   0xb   :  { %624 = dma.done.wait [#allocation4], 2048  }
   0xc   :  { %625 = vsyncadd [#allocation4], 4294965248 }
   0xd   :  { %626 = dma.done.wait [#allocation6], 2048  }
   0xe   :  { %627 = vsyncadd [#allocation6], 4294965248  ;;  %v456_v1 = vld [vmem:[#allocation3 + $0x70] sm:$0xf]  ;;  %v541_v2 = vld [vmem:[#allocation3 + $0x74] sm:$0xf0] }
   0xf   :  { %v540_v3 = vld [vmem:[#allocation3 + $0x74] sm:$0xf]  ;;  %v457_v4 = vor.u32 %v541_v2, %v456_v1  ;;  %v458_v5 = vld [vmem:[#allocation3 + $0x78] sm:$0xf0]  ;;  %v448_v6 = vld [vmem:[#allocation3 + $0x60] sm:$0xf] }
  0x10   :  { %v539_v7 = vld [vmem:[#allocation3 + $0x64] sm:$0xf0]  ;;  %v461_v8 = vor.u32 %v540_v3, %v458_v5  ;;  %v538_v9 = vld [vmem:[#allocation3 + $0x64] sm:$0xf]  ;;  %v450_v10 = vld [vmem:[#allocation3 + $0x68] sm:$0xf0] }
  0x11   :  { %165 = vmatpush.bf16.msra.mxu0 %v457_v4  ;;  %v449_v11 = vor.u32 %v539_v7, %v448_v6  ;;  %v453_v12 = vor.u32 %v538_v9, %v450_v10  ;;  %v440_v13 = vld [vmem:[#allocation3 + $0x50] sm:$0xf]  ;;  %v537_v14 = vld [vmem:[#allocation3 + $0x54] sm:$0xf0]  ;;  %v536_v15 = vld [vmem:[#allocation3 + $0x54] sm:$0xf] }
  0x12   :  { %178 = vmatpush.bf16.msra.mxu1 %v461_v8  ;;  %v442_v16 = vld [vmem:[#allocation3 + $0x58] sm:$0xf0]  ;;  %v441_v17 = vor.u32 %v537_v14, %v440_v13  ;;  %v432_v19 = vld [vmem:[#allocation3 + $0x40] sm:$0xf]  ;;  %v535_v20 = vld [vmem:[#allocation3 + $0x44] sm:$0xf0] }
  0x13   :  { %v445_v18 = vor.u32 %v536_v15, %v442_v16  ;;  %v534_v21 = vld [vmem:[#allocation3 + $0x44] sm:$0xf]  ;;  %v434_v22 = vld [vmem:[#allocation3 + $0x48] sm:$0xf0]  ;;  %v433_v23 = vor.u32 %v535_v20, %v432_v19  ;;  %v424_v24 = vld [vmem:[#allocation3 + $0x30] sm:$0xf] }
  0x14   :  { %v549_v25 = vld [vmem:[#allocation5 + $0x38] sm:$0xff]  ;;  %v437_v27 = vor.u32 %v534_v21, %v434_v22  ;;  %v532_v29 = vld [vmem:[#allocation3 + $0x34] sm:$0xf]  ;;  %v416_v35 = vld [vmem:[#allocation3 + $0x20] sm:$0xf]  ;;  %vm385_vm0 = vcmask 7168  }
  0x15   :  { %166 = vmatpush.bf16.msra.mxu0 %v449_v11  ;;  %v557_v26 = vld [vmem:[#allocation5 + $0x78] sm:$0xff]  ;;  %265 = vmatpush.bf16.msra.mxu2 %v549_v25  ;;  %v548_v31 = vld [vmem:[#allocation5 + $0x30] sm:$0xff]  ;;  %v531_v36 = vld [vmem:[#allocation3 + $0x24] sm:$0xf0] }
  0x16   :  { %179 = vmatpush.bf16.msra.mxu1 %v453_v12  ;;  %v533_v28 = vld [vmem:[#allocation3 + $0x34] sm:$0xf0]  ;;  %v426_v30 = vld [vmem:[#allocation3 + $0x38] sm:$0xf0]  ;;  %351 = vmatpush.bf16.msra.mxu3 %v557_v26  ;;  %v556_v32 = vld [vmem:[#allocation5 + $0x70] sm:$0xff]  ;;  %v417_v41 = vor.u32 %v531_v36, %v416_v35 }
  0x17   :  { %v425_v33 = vor.u32 %v533_v28, %v424_v24  ;;  %v429_v34 = vor.u32 %v532_v29, %v426_v30  ;;  %v530_v37 = vld [vmem:[#allocation3 + $0x24] sm:$0xf]  ;;  %v418_v38 = vld [vmem:[#allocation3 + $0x28] sm:$0xf0]  ;;  %v408_v43 = vld [vmem:[#allocation3 + $0x10] sm:$0xf] }
  0x18   :  { %v547_v39 = vld [vmem:[#allocation5 + $0x28] sm:$0xff]  ;;  %v421_v42 = vor.u32 %v530_v37, %v418_v38  ;;  %v529_v44 = vld [vmem:[#allocation3 + $0x14] sm:$0xf0]  ;;  %v528_v45 = vld [vmem:[#allocation3 + $0x14] sm:$0xf] }
  0x19   :  { %167 = vmatpush.bf16.msra.mxu0 %v441_v17  ;;  %266 = vmatpush.bf16.msra.mxu2 %v548_v31  ;;  %v555_v40 = vld [vmem:[#allocation5 + $0x68] sm:$0xff]  ;;  %v410_v46 = vld [vmem:[#allocation3 + $0x18] sm:$0xf0]  ;;  %v546_v47 = vld [vmem:[#allocation5 + $0x20] sm:$0xff]  ;;  %v409_v48 = vor.u32 %v529_v44, %v408_v43 }
  0x1a   :  { %180 = vmatpush.bf16.msra.mxu1 %v445_v18  ;;  %352 = vmatpush.bf16.msra.mxu3 %v556_v32  ;;  %v413_v49 = vor.u32 %v528_v45, %v410_v46  ;;  %v400_v50 = vld [vmem:[#allocation3] sm:$0xf]  ;;  %v527_v51 = vld [vmem:[#allocation3 + $0x4] sm:$0xf0]  ;;  %v526_v52 = vld [vmem:[#allocation3 + $0x4] sm:$0xf] }
  0x1b   :  { %v402_v53 = vld [vmem:[#allocation3 + $0x8] sm:$0xf0]  ;;  %v401_v54 = vor.u32 %v527_v51, %v400_v50  ;;  %v62_v56 = vld [vmem:[%s709_s0] sm:$0xf]  ;;  %v544_v59 = vld [vmem:[#allocation5 + $0x10] sm:$0xff] }
  0x1c   :  { %v405_v55 = vor.u32 %v526_v52, %v402_v53  ;;  %v545_v57 = vld [vmem:[#allocation5 + $0x18] sm:$0xff]  ;;  %v554_v58 = vld [vmem:[#allocation5 + $0x60] sm:$0xff]  ;;  %v543_v61 = vld [vmem:[#allocation5 + $0x8] sm:$0xff] }
  0x1d   :  { %168 = vmatpush.bf16.msra.mxu0 %v433_v23  ;;  %267 = vmatpush.bf16.msra.mxu2 %v547_v39  ;;  %v553_v60 = vld [vmem:[#allocation5 + $0x58] sm:$0xff]  ;;  %v552_v62 = vld [vmem:[#allocation5 + $0x50] sm:$0xff]  ;;  %v542_v63 = vld [vmem:[#allocation5] sm:$0xff] }
  0x1e   :  { %181 = vmatpush.bf16.msra.mxu1 %v437_v27  ;;  %353 = vmatpush.bf16.msra.mxu3 %v555_v40  ;;  %v551_v0 = vld [vmem:[#allocation5 + $0x48] sm:$0xff]  ;;  %v550_v1 = vld [vmem:[#allocation5 + $0x40] sm:$0xff]  ;;  %v564_v19 = vld [vmem:[%s713_s4] ss:$0 sm:$0xff] }
  0x1f   :  { %v79_v2 = vld [vmem:[%s711_s2] sm:$0x3] }
  0x20   :  { %v81_v3 = vperm.slane %v79_v2, 0  ;;  %v82_v4 = vperm.slane %v79_v2, 1  ;;  %v565_v22 = vld [vmem:[%s713_s4 + $0x1] ss:$0 sm:$0xff]  ;;  %v566_v35 = vld [vmem:[%s714_s5] ss:$0 sm:$0xff] }
  0x21   :  { %169 = vmatpush.bf16.msra.mxu0 %v425_v33  ;;  %268 = vmatpush.bf16.msra.mxu2 %v546_v47  ;;  %v567_v38 = vld [vmem:[#allocation2] ss:$0 sm:$0xff] }
  0x22   :  { %182 = vmatpush.bf16.msra.mxu1 %v429_v34  ;;  %354 = vmatpush.bf16.msra.mxu3 %v554_v58 }
  0x25   :  { %170 = vmatpush.bf16.msra.mxu0 %v417_v41  ;;  %269 = vmatpush.bf16.msra.mxu2 %v545_v57 }
  0x26   :  { %183 = vmatpush.bf16.msra.mxu1 %v421_v42  ;;  %355 = vmatpush.bf16.msra.mxu3 %v553_v60 }
  0x29   :  { %171 = vmatpush.bf16.msra.mxu0 %v409_v48  ;;  %270 = vmatpush.bf16.msra.mxu2 %v544_v59 }
  0x2a   :  { %184 = vmatpush.bf16.msra.mxu1 %v413_v49  ;;  %356 = vmatpush.bf16.msra.mxu3 %v552_v62 }
  0x2d   :  { %172 = vmatpush.bf16.msra.mxu0 %v401_v54  ;;  %271 = vmatpush.bf16.msra.mxu2 %v543_v61 }
  0x2e   :  { %185 = vmatpush.bf16.msra.mxu1 %v405_v55  ;;  %357 = vmatpush.bf16.msra.mxu3 %v551_v0 }
  0x30   :  { %173 = vmatmul.bf16.vlgmr.msra.gmra.mxu0 %v62_v56 }
  0x31   :  { %186 = vmatmul.bf16.vlgmr.msra.gmra.mxu1 %v62_v56  ;;  %272 = vmatpush.bf16.msra.mxu2 %v542_v63 }
  0x32   :  { %358 = vmatpush.bf16.msra.mxu3 %v550_v1 }
  0xad   :  { %v174_v5 = vpop.f32.mrf.mxu0 }
  0xae   :  { %v175_v6 = vadd.f32 %v174_v5, %v81_v3  ;;  %v187_v7 = vpop.f32.mrf.mxu1 }
  0xaf   :  { %v188_v8 = vadd.f32 %v187_v7, %v82_v4 }
  0xb1   :  { %v191_v9 = vpack.c.bf16 %v188_v8, %v175_v6 }
  0xb3   :  { %v192_v10 = vunpack.c.l.bf16 %v191_v9  ;;  %v193_v11 = vunpack.c.h.bf16 %v191_v9 }
  0xb5   :  { %568 = vtanh.f32 %v192_v10  ;;  %v176_v12 = vpop.f32.mrf.mxu0 }
  0xb6   :  { %570 = vtanh.f32 %v193_v11  ;;  %v189_v13 = vpop.f32.mrf.mxu1 }
  0xbb   :  { %v569_v14 = vpop.eup %568 }
  0xbc   :  { %v571_v15 = vpop.eup %570 }
  0xbd   :  { %v196_v16 = vpack.c.bf16 %v571_v15, %v569_v14 }
  0xbf   :  { %273 = vmatmul.bf16.vlgmr.msra.gmra.mxu2 %v196_v16  ;;  %v300_v17 = vunpack.c.h.b16 %v196_v16 }
  0xc1   :  { %v301_v18 = vpack.c.b16 %v300_v17, %v300_v17 }
  0xc3   :  { %359 = vmatmul.bf16.vlgmr.msra.gmra.mxu3 %v301_v18 }
 0x142   :  { %v274_v20 = vpop.f32.mrf.mxu2 }
 0x143   :  { %v275_v21 = vadd.f32 %v564_v19, %v274_v20 }
 0x145   :  { %v364_v23 = vpack.c.bf16 %v275_v21, %v275_v21 }
 0x146   :  { %v360_v24 = vpop.f32.mrf.mxu3 }
 0x147   :  { %v365_v25 = vunpack.c.l.bf16 %v364_v23  ;;  %v361_v26 = vadd.f32 %v565_v22, %v360_v24 }
 0x149   :  { %572 = vtanh.f32 %v365_v25  ;;  %v368_v27 = vpack.c.bf16 %v361_v26, %v361_v26 }
 0x14a   :  { %v276_v28 = vpop.f32.mrf.mxu2 }
 0x14b   :  { %v369_v29 = vunpack.c.l.bf16 %v368_v27 }
 0x14d   :  { %574 = vtanh.f32 %v369_v29 }
 0x14e   :  { %v362_v30 = vpop.f32.mrf.mxu3 }
 0x14f   :  { %v573_v31 = vpop.eup %572 }
 0x150   :  { %v367_v32 = vpack.c.bf16 %v573_v31, %v573_v31 }
 0x152   :  { %387 = vst [vmem:[%s717_s8] sm:$0xf] %v367_v32 }
 0x153   :  { %v575_v33 = vpop.eup %574 }
 0x154   :  { %v371_v34 = vpack.c.bf16 %v575_v33, %v575_v33 }
 0x156   :  { %v372_v36 = vunpack.c.l.bf16 %v371_v34 }
 0x158   :  { %v377_v37 = vmul.f32 %v566_v35, %v372_v36 }
 0x15a   :  { %378 = vadd.xlane.f32.xlu0 %v377_v37 }
 0x1cd   :  { %v379_v39 = vpop.xlane.xlu0 %378 }
 0x1ce   :  { %v384_v40 = vadd.f32 %v567_v38, %v379_v39 }
 0x1d0   :  { %386 = vst.msk [vmem:[%s716_s7] sm:$0xff] %vm385_vm0, %v384_v40 }
 0x1d1   :  { %396 = vsyncpa [#allocation4], 1 }
 0x1d2   :  { %397 = vsyncpa [#allocation6], 1 }

</bundles_post_ra>
